<compile_context>
chip_gen: v5e
topology: v5e:2x2
jax: 0.10.0
libtpu: 0.0.40
codegen_flags: <defaults>
</compile_context>

<pallas_src>
import jax
import jax.numpy as jnp
from jax.experimental import pallas as pl
from jax.experimental.pallas import tpu as pltpu

_LANE = 128      # lane width (last dim)
_SUBLANE = 8     # sublane width (second-to-last dim)


def _round_up(n, m):
    return ((n + m - 1) // m) * m


def _pad2(a, rows, cols):
    pr, pc = rows - a.shape[0], cols - a.shape[1]
    if pr or pc:
        a = jnp.pad(a, ((0, pr), (0, pc)))
    return a


def _mlp_kernel(x_ref, w1_ref, b1_ref, w2_ref, b2_ref, o_ref):
    # fc1 on the MXU with f32 accumulation.
    h = jnp.dot(x_ref[...], w1_ref[...], preferred_element_type=jnp.float32)
    # Bias + ReLU epilogue in f32 (v5e's VPU/EUP have no bf16 path).
    h = jnp.maximum(h + b1_ref[...], 0.0)
    # Feed fc2 at the weight dtype (bf16 on v6e/v7x fast path, f32 otherwise).
    out = jnp.dot(h.astype(w2_ref.dtype), w2_ref[...],
                  preferred_element_type=jnp.float32)
    out = out + b2_ref[...]
    o_ref[...] = out.astype(o_ref.dtype)


def _vmem_footprint(t, in_p, hid_p, nc_p, x_bytes, w_bytes, out_bytes, x_bufs):
    """Conservative VMEM bytes for one tile config (weights counted at 2 buffers)."""
    return (x_bufs * t * in_p * x_bytes                     # x pipeline buffers
            + 2 * t * nc_p * out_bytes                      # out double buffer
            + 2 * (in_p * hid_p + hid_p * nc_p) * w_bytes   # weights (worst case)
            + 2 * (hid_p + nc_p) * 4                        # biases (f32)
            + t * hid_p * 4)                                # live f32 intermediate h


def switch_model_forward(x, w1, b1, w2, b2, *, tm=512, mxu_dtype=None,
                         vmem_budget_bytes=40 * 1024 * 1024):
    """Fused SwitchModel forward.

    x: (B, input_size); w1: (input_size, hidden); b1: (1, hidden) or (hidden,);
    w2: (hidden, num_classes); b2: (1, num_classes) or (num_classes,).
    mxu_dtype: optional dtype (e.g. jnp.bfloat16) for the matmul inputs on
    v6e/v7x; accumulation and the bias/ReLU epilogue stay f32 and the output
    keeps x.dtype.
    """
    B, in_f = x.shape
    hid = w1.shape[1]
    nc = w2.shape[1]
    out_dtype = x.dtype

    # Lane-dense padded feature dims (zero padding -> identical math).
    in_p = _round_up(in_f, _LANE)
    hid_p = _round_up(hid, _LANE)
    nc_p = _round_up(nc, _LANE)

    x_bytes = jnp.dtype(mxu_dtype or x.dtype).itemsize
    w_bytes = jnp.dtype(mxu_dtype or w1.dtype).itemsize
    out_bytes = jnp.dtype(out_dtype).itemsize

    # Deepen the x pipeline when per-tile compute is small (mem-bound regime).
    weight_elems = in_p * hid_p + hid_p * nc_p
    x_bufs = 3 if weight_elems <= 256 * 1024 else 2

    # Batch tile: pick from candidates the one that minimizes round_up(B, tm)
    # padding waste while its VMEM footprint fits the budget (v7x-safe: 64 MiB).
    tm_cap = _round_up(min(tm, max(B, 1)), _SUBLANE)
    cands = sorted({c for c in (tm_cap, 512, 384, 256, 128, 64, 32, 16, 8)
                    if c <= tm_cap})
    feasible = [t for t in cands
                if _vmem_footprint(t, in_p, hid_p, nc_p, x_bytes, w_bytes,
                                   out_bytes, x_bufs) <= vmem_budget_bytes]
    if not feasible:
        feasible = [cands[0]]  # smallest tile; raise the VMEM limit instead of failing
    tm_eff = min(feasible, key=lambda t: (_round_up(B, t) - B, -t))
    b_p = _round_up(B, tm_eff)

    footprint = _vmem_footprint(tm_eff, in_p, hid_p, nc_p, x_bytes, w_bytes,
                                out_bytes, x_bufs)
    vmem_limit = max(16 << 20, min(int(footprint * 1.25) + (4 << 20), 64 << 20))

    # Host-side padding (no-op / skipped when shapes are already aligned).
    xp = _pad2(x, b_p, in_p)
    w1p = _pad2(w1, in_p, hid_p)
    b1p = _pad2(b1.reshape(1, -1), 1, hid_p).astype(jnp.float32)
    w2p = _pad2(w2, hid_p, nc_p)
    b2p = _pad2(b2.reshape(1, -1), 1, nc_p).astype(jnp.float32)
    if mxu_dtype is not None:
        xp = xp.astype(mxu_dtype)
        w1p = w1p.astype(mxu_dtype)
        w2p = w2p.astype(mxu_dtype)

    grid = (pl.cdiv(b_p, tm_eff),)

    cost = pl.CostEstimate(
        flops=2 * b_p * (in_p * hid_p + hid_p * nc_p),
        transcendentals=0,
        bytes_accessed=(b_p * in_p * x_bytes
                        + (in_p * hid_p + hid_p * nc_p) * w_bytes
                        + (hid_p + nc_p) * 4
                        + b_p * nc_p * out_bytes),
    )

    def run(use_pipeline_modes):
        if use_pipeline_modes:
            # x / out tiles march along the batch axis; weights stay VMEM-resident
            # and are single-buffered (constant index map -> DMA'd exactly once).
            x_spec = pl.BlockSpec((tm_eff, in_p), lambda i: (i, 0),
                                  pipeline_mode=pl.Buffered(x_bufs))
            w1_spec = pl.BlockSpec((in_p, hid_p), lambda i: (0, 0),
                                   pipeline_mode=pl.Buffered(1))
            b1_spec = pl.BlockSpec((1, hid_p), lambda i: (0, 0),
                                   pipeline_mode=pl.Buffered(1))
            w2_spec = pl.BlockSpec((hid_p, nc_p), lambda i: (0, 0),
                                   pipeline_mode=pl.Buffered(1))
            b2_spec = pl.BlockSpec((1, nc_p), lambda i: (0, 0),
                                   pipeline_mode=pl.Buffered(1))
        else:
            x_spec = pl.BlockSpec((tm_eff, in_p), lambda i: (i, 0))
            w1_spec = pl.BlockSpec((in_p, hid_p), lambda i: (0, 0))
            b1_spec = pl.BlockSpec((1, hid_p), lambda i: (0, 0))
            w2_spec = pl.BlockSpec((hid_p, nc_p), lambda i: (0, 0))
            b2_spec = pl.BlockSpec((1, nc_p), lambda i: (0, 0))

        return pl.pallas_call(
            _mlp_kernel,
            out_shape=jax.ShapeDtypeStruct((b_p, nc_p), out_dtype),
            grid=grid,
            in_specs=[x_spec, w1_spec, b1_spec, w2_spec, b2_spec],
            out_specs=pl.BlockSpec((tm_eff, nc_p), lambda i: (i, 0)),
            compiler_params=pltpu.CompilerParams(
                # Batch axis is independent -> shards across both TCs on v7x.
                # TODO(synk): if xprof shows one TC idle, try pltpu.CORE_PARALLEL.
                dimension_semantics=("parallel",),
                vmem_limit_bytes=vmem_limit,
            ),
            cost_estimate=cost,
        )(xp, w1p, b1p, w2p, b2p)

    try:
        out = run(True)
    except Exception:
        # pipeline_mode / Buffered(1) unsupported on this jax build -> default buffering.
        out = run(False)

    # Strip batch / class padding.  Output dtype follows x.dtype by design.
    return out[:B, :nc]


def reference_forward(x, w1, b1, w2, b2):
    h = jnp.maximum(x @ w1 + b1, 0.0)
    return h @ w2 + b2


if __name__ == "__main__":
    # Small shapes consistent with the module's forward.  tm=8 makes the tiny
    # test exercise a multi-step (pipelined, >=2 tiles) batch grid.
    batch, input_size, hidden_size, num_classes = 16, 16, 32, 8

    key = jax.random.PRNGKey(0)
    kx, kw1, kb1, kw2, kb2 = jax.random.split(key, 5)

    x = jax.random.normal(kx, (batch, input_size), dtype=jnp.float32)
    w1 = jax.random.normal(kw1, (input_size, hidden_size), dtype=jnp.float32) * 0.1
    b1 = jax.random.normal(kb1, (1, hidden_size), dtype=jnp.float32) * 0.1
    w2 = jax.random.normal(kw2, (hidden_size, num_classes), dtype=jnp.float32) * 0.1
    b2 = jax.random.normal(kb2, (1, num_classes), dtype=jnp.float32) * 0.1

    ref = reference_forward(x, w1, b1, w2, b2)

    # f32 path, multi-tile batch grid.
    out = jax.block_until_ready(switch_model_forward(x, w1, b1, w2, b2, tm=8))
    assert out.shape == (batch, num_classes)
    assert out.dtype == x.dtype
    assert jnp.allclose(out, ref, atol=1e-4, rtol=1e-4)

    # bf16 MXU path (v6e/v7x fast path): f32 accumulation + f32 epilogue + f32 output.
    out_bf16 = jax.block_until_ready(
        switch_model_forward(x, w1, b1, w2, b2, tm=8, mxu_dtype=jnp.bfloat16))
    assert out_bf16.dtype == x.dtype
    assert jnp.allclose(out_bf16, ref, atol=5e-2, rtol=5e-2)

    # Ragged batch: exercises batch padding + tail slicing.
    x_odd = x[:10]
    out_odd = jax.block_until_ready(switch_model_forward(x_odd, w1, b1, w2, b2))
    assert out_odd.shape == (10, num_classes)
    assert jnp.allclose(out_odd, reference_forward(x_odd, w1, b1, w2, b2),
                        atol=1e-4, rtol=1e-4)

    print("KERNEL_OK")
</pallas_src>

<mosaic_0001>
module attributes {stable_mosaic.version = 11 : i64} {
  func.func @_mlp_kernel(%arg0: i32, %arg1: memref<8x128xf32, #tpu.memory_space<vmem>>, %arg2: memref<128x128xf32, #tpu.memory_space<vmem>>, %arg3: memref<1x128xf32, #tpu.memory_space<vmem>>, %arg4: memref<128x128xf32, #tpu.memory_space<vmem>>, %arg5: memref<1x128xf32, #tpu.memory_space<vmem>>, %arg6: memref<8x128xf32, #tpu.memory_space<vmem>>) attributes {dimension_semantics = [#tpu.dimension_semantics<parallel>], iteration_bounds = array<i64: 2>, scalar_prefetch = 0 : i64, scratch_operands = 0 : i64, tpu.core_type = #tpu.core_type<tc>, window_params = [{transform_indices = @transform_0, window_bounds = array<i64: 8, 128>}, {pipeline_mode = #tpu.pipeline_mode<synchronous>, transform_indices = @transform_1, window_bounds = array<i64: 128, 128>}, {pipeline_mode = #tpu.pipeline_mode<synchronous>, transform_indices = @transform_2, window_bounds = array<i64: 1, 128>}, {pipeline_mode = #tpu.pipeline_mode<synchronous>, transform_indices = @transform_3, window_bounds = array<i64: 128, 128>}, {pipeline_mode = #tpu.pipeline_mode<synchronous>, transform_indices = @transform_4, window_bounds = array<i64: 1, 128>}, {transform_indices = @transform_5, window_bounds = array<i64: 8, 128>}]} {
    %c0 = arith.constant 0 : index
    %c0_0 = arith.constant 0 : index
    %0 = vector.load %arg1[%c0, %c0_0] : memref<8x128xf32, #tpu.memory_space<vmem>>, vector<8x128xf32>
    %c0_1 = arith.constant 0 : index
    %c0_2 = arith.constant 0 : index
    %1 = vector.load %arg2[%c0_1, %c0_2] : memref<128x128xf32, #tpu.memory_space<vmem>>, vector<128x128xf32>
    %cst = arith.constant dense<0.000000e+00> : vector<8x128xf32>
    %2 = tpu.matmul %0, %1, %cst {dimension_numbers = #tpu.dot_dimension_numbers<[1], [0], [0], [1], [0, 0, 1, 1], [], []>} : vector<8x128xf32>, vector<128x128xf32>, vector<8x128xf32> -> vector<8x128xf32>
    %c0_3 = arith.constant 0 : index
    %c0_4 = arith.constant 0 : index
    %3 = vector.load %arg3[%c0_3, %c0_4] : memref<1x128xf32, #tpu.memory_space<vmem>>, vector<1x128xf32>
    %4 = vector.broadcast %3 : vector<1x128xf32> to vector<8x128xf32>
    %5 = arith.addf %2, %4 : vector<8x128xf32>
    %cst_5 = arith.constant 0.000000e+00 : f32
    %6 = vector.broadcast %cst_5 : f32 to vector<8x128xf32>
    %7 = arith.maximumf %5, %6 : vector<8x128xf32>
    %c0_6 = arith.constant 0 : index
    %c0_7 = arith.constant 0 : index
    %8 = vector.load %arg4[%c0_6, %c0_7] : memref<128x128xf32, #tpu.memory_space<vmem>>, vector<128x128xf32>
    %cst_8 = arith.constant dense<0.000000e+00> : vector<8x128xf32>
    %9 = tpu.matmul %7, %8, %cst_8 {dimension_numbers = #tpu.dot_dimension_numbers<[1], [0], [0], [1], [0, 0, 1, 1], [], []>} : vector<8x128xf32>, vector<128x128xf32>, vector<8x128xf32> -> vector<8x128xf32>
    %c0_9 = arith.constant 0 : index
    %c0_10 = arith.constant 0 : index
    %10 = vector.load %arg5[%c0_9, %c0_10] : memref<1x128xf32, #tpu.memory_space<vmem>>, vector<1x128xf32>
    %11 = vector.broadcast %10 : vector<1x128xf32> to vector<8x128xf32>
    %12 = arith.addf %9, %11 : vector<8x128xf32>
    %c0_11 = arith.constant 0 : index
    %c0_12 = arith.constant 0 : index
    %13 = vector.load %arg6[%c0_11, %c0_12] : memref<8x128xf32, #tpu.memory_space<vmem>>, vector<8x128xf32>
    tpu.vector_store %arg6[%c0_11, %c0_12], %12 {strides = array<i32>} : memref<8x128xf32, #tpu.memory_space<vmem>>, vector<8x128xf32>,
    return
  }
  func.func @transform_0(%arg0: i32) -> (i32, i32) {
    %c0_i32 = arith.constant 0 : i32
    %c0_i32_0 = arith.constant 0 : i32
    return %arg0, %c0_i32 : i32, i32
  }
  func.func @transform_1(%arg0: i32) -> (i32, i32) {
    %c0_i32 = arith.constant 0 : i32
    %c0_i32_0 = arith.constant 0 : i32
    %c0_i32_1 = arith.constant 0 : i32
    return %c0_i32, %c0_i32_0 : i32, i32
  }
  func.func @transform_2(%arg0: i32) -> (i32, i32) {
    %c0_i32 = arith.constant 0 : i32
    %c0_i32_0 = arith.constant 0 : i32
    %c0_i32_1 = arith.constant 0 : i32
    return %c0_i32, %c0_i32_0 : i32, i32
  }
  func.func @transform_3(%arg0: i32) -> (i32, i32) {
    %c0_i32 = arith.constant 0 : i32
    %c0_i32_0 = arith.constant 0 : i32
    %c0_i32_1 = arith.constant 0 : i32
    return %c0_i32, %c0_i32_0 : i32, i32
  }
  func.func @transform_4(%arg0: i32) -> (i32, i32) {
    %c0_i32 = arith.constant 0 : i32
    %c0_i32_0 = arith.constant 0 : i32
    %c0_i32_1 = arith.constant 0 : i32
    return %c0_i32, %c0_i32_0 : i32, i32
  }
  func.func @transform_5(%arg0: i32) -> (i32, i32) {
    %c0_i32 = arith.constant 0 : i32
    %c0_i32_0 = arith.constant 0 : i32
    return %arg0, %c0_i32 : i32, i32
  }
}

</mosaic_0001>

<bundles_post_ra>
// kernel: tpu_custom_call.1
= control target key start
LH: loop header
LB: loop body
LE: loop exit
PB: predicated region body
PF: predicated region fallthrough
CT: control target
= control target key end

     0   :  { %10 = vsyncpa [#allocation3], 0  ;;  %s904_s0 = inlined_call_operand.hbm [shape: f32[16,128], index: 0, kind: input, shape index: {}]   ;;  %s905_s1 = inlined_call_operand.hbm [shape: f32[128,128], index: 1, kind: input, shape index: {}]   ;;  %s906_s2 = inlined_call_operand.vmem [shape: f32[1,128], index: 2, kind: input, shape index: {}]   ;;  %s907_s3 = inlined_call_operand.hbm [shape: f32[128,128], index: 3, kind: input, shape index: {}]   ;;  %s908_s4 = inlined_call_operand.vmem [shape: f32[1,128], index: 4, kind: input, shape index: {}]   ;;  %s909_s5 = inlined_call_operand.hbm [shape: f32[16,128], index: 5, kind: output, shape index: {}]  }
   0x1   :  { %12 = vsyncpa [#allocation3 + $0x1], 0 }
   0x2   :  { %13 = vsyncpa [#allocation6], 0 }
   0x3   :  { %14 = vsyncpa [#allocation4], 0 }
   0x4   :  { %16 = vsyncpa [#allocation4 + $0x1], 0  ;;  %s746_s18 = smov 0   ;;  %s748_s19 = smov 0  }
   0x5   :  { %s750_s20 = smov 0   ;;  %s752_s21 = smov 0  }
   0x6 LB: > { %s174_s24 = sshll.u32 %s905_s1, 4  ;;  %s770_s25 = sadd.s32 4294967295, %s710_s21   ;;  %s710_s21 = sphi %s752_s21, %s920_s21   ;;  %s706_s20 = sphi %s750_s20, %s919_s20   ;;  %s702_s19 = sphi %s748_s19, %s918_s19   ;;  %s698_s18 = sphi %s746_s18, %s917_s18   ;;  %s175_s24 = int_to_ptr.hbm [resolvable:$true] %s174_s24 }
   0x7   : > { %p464_p0 = scmp.ge.s32.totalorder %s710_s21, 1  ;;  %p43_p1 = scmp.eq.s32.totalorder %s770_s25, 0 }
   0x8   : > { %p163_p2 = scmp.lt.s32.totalorder %s710_s21, 3  ;;  %s712_s27 = smov [#allocation5]  }
   0x9   : > { %s176_s28 = sshll.u32 %s712_s27, 4  ;;  %s191_s6 = sshll.u32 %s907_s3, 4  ;;  %s177_s28 = int_to_ptr.vmem [resolvable:$true] %s176_s28  ;;  %s192_s6 = int_to_ptr.hbm [resolvable:$true] %s191_s6 }
   0xa   : > { %p775_p3 = pnand %p464_p0, %p163_p2  ;;  %s713_s7 = smov [#allocation7]  }
   0xb   : > { %s193_s8 = sshll.u32 %s713_s7, 4  ;;  %s714_s9 = smov 128   ;;  %s194_s8 = int_to_ptr.vmem [resolvable:$true] %s193_s8 }
   0xc   : > { %p491_p4 = pneg %p775_p3  ;;  %s715_s10 = smov 8  }
   0xd   : > { %s463_s11 = sadd.s32 4294967294, %s710_s21   ;;  %s789_s12 = sadd.s32 1, %s710_s21  }
   0xe   : > { %p492_p6 = pnand %p491_p4, %p43_p1  ;;  %s26_s13 = ssub.s32 %s710_s21, %s789_s12 }
   0xf   : > { %s29_s14 = sadd.s32 1, %s706_s20  ;;  %p27_p7 = scmp.eq.s32.totalorder %s26_s13, 0 }
  0x10   : > { %494 = dma.hbm_to_vmem [thread:$0]  (!%p492_p6), %s175_s24, 2048, %s177_s28, [#allocation6], %s714_s9, %s714_s9, %s715_s10  }
  0x11   : > { %497 = dma.hbm_to_vmem [thread:$0]  (!%p492_p6), %s192_s6, 2048, %s194_s8, [#allocation6], %s714_s9, %s714_s9, %s715_s10  }
  0x12   : > { %p36_p8 = scmp.ne.s32.totalorder %s706_s20, %s702_s19  ;;  %p37_p9 = scmp.eq.s32.totalorder %s710_s21, 0 }
  0x13   : > { %p42_p10 = scmp.ne.s32.totalorder %s702_s19, %s698_s18  ;;  %p150_p13 = scmp.eq.s32.totalorder %s770_s25, 1 }
  0x14   : > { %s800_s15 = scalar_select %p27_p7, %s706_s20, %s29_s14  }
  0x15   : > { %p802_p11 = por %p37_p9, %p36_p8  ;;  %p808_p12 = por %p43_p1, %p42_p10 }
  0x16   : > { %p156_p0 = scmp.eq.s32.totalorder %s463_s11, 1  ;;  %p508_p2 = scmp.lt.s32.totalorder %s710_s21, 2 }
  0x17   : > { %s210_s22 = sand.u32 1, %s706_s20   ;;  %p815_p4 = por %p150_p13, %p36_p8 }
  0x18   : > { %p819_p6 = por %p156_p0, %p42_p10  ;;  %s468_s27 = sshll.u32 %s210_s22, 3 }
  0x19   : > { %s469_s28 = sshll.u32 %s710_s21, 3  ;;  %s214_s7 = scalar_lea.vmem [#allocation2], %s468_s27 }
  0x1a   : > { %s218_s6 = scalar_lea.hbm %s904_s0, %s469_s28  ;;  %s222_s8 = sshll.u32 %s214_s7, 4  ;;  %s223_s8 = int_to_ptr.vmem [resolvable:$true] %s222_s8 }
  0x1b   : > { %s220_s9 = sshll.u32 %s218_s6, 4  ;;  %p829_p7 = pnand %p508_p2, %p802_p11  ;;  %s221_s9 = int_to_ptr.hbm [resolvable:$true] %s220_s9 }
  0x1c   : > { %s211_s11 = scalar_lea.sflag [#allocation3], %s210_s22  ;;  %s610_s13 = sshra.s32 %s221_s9, 4  ;;  %s611_s13 = int_to_ptr.hbm [resolvable:$true] %s610_s13 }
  0x1d   : > { %s612_s14 = scalar_lea.hbm %s611_s13, 8  ;;  %p614_p9 = pneg %p829_p7 }
  0x1e   : > { %p613_p8 = scmp.ne.s32.totalorder %s611_s13, %s612_s14  ;;  %s617_s29 = scalar_lea.hbm %s904_s0, 16 }
  0x1f   : > { %p618_p11 = scmp.lt.s32.totalorder %s611_s13, %s904_s0  ;;  %p619_p0 = scmp.lt.s32.totalorder %s617_s29, %s612_s14 }
  0x20   : > { %p615_p10 = pnand %p614_p9, %p613_p8 }
  0x21   : > { %p620_p2 = por %p619_p0, %p618_p11 }
  0x22   : > { %p616_p13 = pneg %p615_p10 }
  0x24   : > { %p621_p5 = pnand %p620_p2, %p616_p13 }
  0x26   : > { %624 = shalt.err (!%p621_p5)
}
  0x27   : > { %501 = dma.hbm_to_vmem [thread:$0]  (!%p829_p7), %s221_s9, 128, %s223_s8, %s211_s11  }
  0x28   : > { %231 = sbr.rel (%p775_p3) target bundleno = 341 (0x155), region = 40  ;;  %s846_s22 = sand.u32 (!%p775_p3), 1, %s702_s19  }
  0x29   : > { %s471_s6 = sshll.u32 (!%p775_p3), %s846_s22, 3  ;;  %s234_s7 = scalar_lea.sflag (!%p775_p3), [#allocation3], %s846_s22 }
  0x2a   : > { %s852_s13 = scalar_lea.vmem (!%p775_p3), [#allocation2], %s471_s6 }
  0x2d   : > { %685 = dma.done.wait (%p808_p12), %s234_s7, 128  }
  0x2e   : > { %687 = vsyncadd (%p808_p12), %s234_s7, 4294967168 }
  0x2f   : > { %689 = dma.done.wait (%p43_p1), [#allocation6], 4096  }
  0x30   : > { %691 = vsyncadd (%p43_p1), [#allocation6], 4294963200  ;;  %v291_v0 = vld [vmem:[#allocation5 + $0x78] sm:$0xff]  ;;  %v290_v1 = vld [vmem:[#allocation5 + $0x70] sm:$0xff]  ;;  %s476_s8 = sshll.u32 %s770_s25, 3  ;;  %s274_s28 = scalar_lea.vmem [#allocation8], %s471_s6 }
  0x31   : > { %296 = vmatpush.msra.mxu0 %v291_v0  ;;  %v289_v2 = vld [vmem:[#allocation5 + $0x68] sm:$0xff]  ;;  %v288_v3 = vld [vmem:[#allocation5 + $0x60] sm:$0xff]  ;;  %v332_v4 = vld [vmem:[#allocation7 + $0x78] sm:$0xff]  ;;  %s369_s11 = scalar_lea.hbm %s909_s5, %s476_s8  ;;  %s371_s29 = sshll.u32 %s274_s28, 4  ;;  %s372_s29 = int_to_ptr.vmem [resolvable:$true] %s371_s29 }
  0x32   : > { %v287_v5 = vld [vmem:[#allocation5 + $0x58] sm:$0xff]  ;;  %337 = vmatpush.msra.mxu1 %v332_v4  ;;  %v331_v6 = vld [vmem:[#allocation7 + $0x70] sm:$0xff]  ;;  %v330_v7 = vld [vmem:[#allocation7 + $0x68] sm:$0xff]  ;;  %s373_s30 = sshll.u32 %s369_s11, 4  ;;  %s359_s16 = scalar_lea.sflag [#allocation4], %s846_s22  ;;  %s374_s30 = int_to_ptr.hbm [resolvable:$true] %s373_s30 }
  0x33   : > { %297 = vmatpush.msra.mxu0 %v290_v1  ;;  %v286_v8 = vld [vmem:[#allocation5 + $0x50] sm:$0xff]  ;;  %v329_v9 = vld [vmem:[#allocation7 + $0x60] sm:$0xff]  ;;  %v285_v10 = vld [vmem:[#allocation5 + $0x48] sm:$0xff]  ;;  %s654_s25 = sshra.s32 %s374_s30, 4  ;;  %s660_s17 = scalar_lea.hbm %s909_s5, 16  ;;  %s655_s25 = int_to_ptr.hbm [resolvable:$true] %s654_s25 }
  0x34   : > { %338 = vmatpush.msra.mxu1 %v331_v6  ;;  %v328_v11 = vld [vmem:[#allocation7 + $0x58] sm:$0xff]  ;;  %v284_v12 = vld [vmem:[#allocation5 + $0x40] sm:$0xff]  ;;  %v327_v13 = vld [vmem:[#allocation7 + $0x50] sm:$0xff]  ;;  %s656_s7 = scalar_lea.hbm %s655_s25, 8  ;;  %p661_p12 = scmp.lt.s32.totalorder %s655_s25, %s909_s5 }
  0x35   : > { %298 = vmatpush.msra.mxu0 %v289_v2  ;;  %v283_v14 = vld [vmem:[#allocation5 + $0x38] sm:$0xff]  ;;  %v326_v15 = vld [vmem:[#allocation7 + $0x48] sm:$0xff]  ;;  %v282_v16 = vld [vmem:[#allocation5 + $0x30] sm:$0xff]  ;;  %p657_p1 = scmp.ne.s32.totalorder %s655_s25, %s656_s7  ;;  %p662_p7 = scmp.lt.s32.totalorder %s660_s17, %s656_s7 }
  0x36   : > { %339 = vmatpush.msra.mxu1 %v330_v7  ;;  %v325_v17 = vld [vmem:[#allocation7 + $0x40] sm:$0xff]  ;;  %v281_v18 = vld [vmem:[#allocation5 + $0x28] sm:$0xff]  ;;  %v324_v19 = vld [vmem:[#allocation7 + $0x38] sm:$0xff] }
  0x37   : > { %299 = vmatpush.msra.mxu0 %v288_v3  ;;  %v280_v20 = vld [vmem:[#allocation5 + $0x20] sm:$0xff]  ;;  %v323_v21 = vld [vmem:[#allocation7 + $0x30] sm:$0xff]  ;;  %v279_v22 = vld [vmem:[#allocation5 + $0x18] sm:$0xff]  ;;  %p658_p3 = pnand %p657_p1, %p815_p4  ;;  %p663_p8 = por %p662_p7, %p661_p12 }
  0x38   : > { %340 = vmatpush.msra.mxu1 %v329_v9  ;;  %v322_v23 = vld [vmem:[#allocation7 + $0x28] sm:$0xff]  ;;  %v278_v24 = vld [vmem:[#allocation5 + $0x10] sm:$0xff]  ;;  %v321_v25 = vld [vmem:[#allocation7 + $0x20] sm:$0xff] }
  0x39   : > { %300 = vmatpush.msra.mxu0 %v287_v5  ;;  %v277_v26 = vld [vmem:[#allocation5 + $0x8] sm:$0xff]  ;;  %v320_v27 = vld [vmem:[#allocation7 + $0x18] sm:$0xff]  ;;  %v276_v28 = vld [vmem:[#allocation5] sm:$0xff]  ;;  %p659_p5 = pneg %p658_p3 }
  0x3a   : > { %341 = vmatpush.msra.mxu1 %v328_v11  ;;  %v275_v29 = vld [vmem:[%s852_s13] sm:$0xff]  ;;  %v318_v31 = vld [vmem:[#allocation7 + $0x8] sm:$0xff]  ;;  %v317_v32 = vld [vmem:[#allocation7] sm:$0xff] }
  0x3b   : > { %301 = vmatpush.msra.mxu0 %v286_v8  ;;  %v319_v30 = vld [vmem:[#allocation7 + $0x10] sm:$0xff]  ;;  %p664_p9 = pnand %p663_p8, %p659_p5 }
  0x3c   : > { %342 = vmatpush.msra.mxu1 %v327_v13  ;;  %v548_v33 = vld [vmem:[%s906_s2] ss:$0 sm:$0xff] }
  0x3d   : > { %302 = vmatpush.msra.mxu0 %v285_v10  ;;  %v549_v37 = vld [vmem:[%s908_s4] ss:$0 sm:$0xff] }
  0x3e   : > { %343 = vmatpush.msra.mxu1 %v326_v15 }
  0x3f   : > { %303 = vmatpush.msra.mxu0 %v284_v12 }
  0x40   : > { %344 = vmatpush.msra.mxu1 %v325_v17 }
  0x41   : > { %304 = vmatpush.msra.mxu0 %v283_v14 }
  0x42   : > { %345 = vmatpush.msra.mxu1 %v324_v19 }
  0x43   : > { %305 = vmatpush.msra.mxu0 %v282_v16 }
  0x44   : > { %346 = vmatpush.msra.mxu1 %v323_v21 }
  0x45   : > { %306 = vmatpush.msra.mxu0 %v281_v18 }
  0x46   : > { %347 = vmatpush.msra.mxu1 %v322_v23 }
  0x47   : > { %307 = vmatpush.msra.mxu0 %v280_v20 }
  0x48   : > { %348 = vmatpush.msra.mxu1 %v321_v25 }
  0x49   : > { %308 = vmatpush.msra.mxu0 %v279_v22 }
  0x4a   : > { %349 = vmatpush.msra.mxu1 %v320_v27 }
  0x4b   : > { %309 = vmatpush.msra.mxu0 %v278_v24 }
  0x4c   : > { %350 = vmatpush.msra.mxu1 %v319_v30 }
  0x4d   : > { %310 = vmatpush.msra.mxu0 %v277_v26 }
  0x4e   : > { %351 = vmatpush.msra.mxu1 %v318_v31 }
  0x4f   : > { %311 = vmatpush.msra.mxu0 %v276_v28 }
  0x50   : > { %312 = vmatmul.f32.vlgmr.msra.gmra.mxu0 %v275_v29  ;;  %352 = vmatpush.msra.mxu1 %v317_v32 }
  0xcd   : > { %v313_v34 = vpop.f32.mrf.mxu0 }
  0xce   : > { %v314_v35 = vadd.f32 %v548_v33, %v313_v34 }
  0xd0   : > { %v316_v36 = vmax.f32 %v314_v35, 0.0 }
  0xd2   : > { %353 = vmatmul.f32.vlgmr.msra.gmra.mxu1 %v316_v36 }
 0x14f   : > { %v354_v38 = vpop.f32.mrf.mxu1 }
 0x150   : > { %v355_v39 = vadd.f32 %v549_v37, %v354_v38 }
 0x152   : > { %357 = vst [vmem:[%s274_s28] sm:$0xff] %v355_v39 }
 0x153   : > { %667 = shalt.err (!%p664_p9)
}
 0x154   : > { %489 = dma.vmem_to_hbm [thread:$0]  (%p815_p4), %s372_s29, 128, %s374_s30, %s359_s16  }
 0x155 PF: > { %s385_s22 = sand.u32 1, %s698_s18   ;;  %p916_p10 = scmp.ge.s32.totalorder %s710_s21, 2 }
 0x156   : > { %s386_s9 = scalar_lea.sflag [#allocation4], %s385_s22 }
 0x157   : > { %p503_p13 = pnand %p916_p10, %p819_p6 }
 0x159   : > { %p504_p11 = pneg %p503_p13 }
 0x15b   : > { %693 = dma.done.wait (%p504_p11), %s386_s9, 128  }
 0x15c   : > { %695 = vsyncadd (%p504_p11), %s386_s9, 4294967168  ;;  %p19_p0 = scmp.ge.s32.totalorder %s789_s12, 4   ;;  %s917_s18 = smov %s702_s19 }
 0x15d   : > { %s918_s19 = smov %s706_s20  ;;  %s919_s20 = smov %s800_s15 }
 0x15e   : > { %s920_s21 = smov %s789_s12  ;;  %21 = sbr.rel (!%p19_p0) target bundleno = 6 (0x6), region = 93 }
 0x163   :  { %392 = vsyncpa [#allocation3], 1 }
 0x164   :  { %394 = vsyncpa [#allocation3 + $0x1], 1 }
 0x165   :  { %395 = vsyncpa [#allocation6], 1 }
 0x166   :  { %396 = vsyncpa [#allocation4], 1 }
 0x167   :  { %398 = vsyncpa [#allocation4 + $0x1], 1 }

</bundles_post_ra>
